<compile_context>
chip_gen: v7x
topology: tpu7x:2x2x1
jax: 0.10.0
libtpu: 0.0.40
codegen_flags: <defaults>
</compile_context>

<pallas_src>
import functools

import jax
import jax.numpy as jnp
from jax.experimental import pallas as pl
from jax.experimental.pallas import tpu as pltpu


def _layer_norm(v, gamma, beta, eps=1e-5):
    mu = jnp.mean(v, axis=-1, keepdims=True)
    var = jnp.mean((v - mu) ** 2, axis=-1, keepdims=True)
    return (v - mu) * jax.lax.rsqrt(var + eps) * gamma + beta


def _pick_tile(S):
    for t in (512, 256, 128, 64, 32, 16, 8):
        if S % t == 0:
            return t
    return S  # small / odd sequence: one full-sequence tile


def _vmem_limit_bytes():
    # Generation-derived VMEM budget (v5e/v6e: 128 MiB; v7x: 64 MiB per TC),
    # leaving headroom for Mosaic's own scratch.
    cap = None
    try:
        cap = getattr(pltpu.get_tpu_info(), "vmem_capacity_bytes", None)
    except Exception:
        cap = None
    if not cap:
        cap = 64 * 1024 * 1024
    return int(cap * 0.85)


# --------------------------------------------------------------------------
# Stage 1: fused QKV projection, head-major outputs.
# --------------------------------------------------------------------------
def _qkv_kernel(x_ref, wqkv_ref, bqkv_ref,          # (TS,D), (D,3D), (1,3D)
                q_ref, kT_ref, v_ref,               # (H,TS,Dh), (H,Dh,TS), (H,TS,Dh)
                *, num_heads, head_dim, scale, compute_dtype):
    cdt = compute_dtype
    D = num_heads * head_dim
    x = x_ref[...].astype(cdt)
    # One wide matmul: N = 3*D, full MXU column utilization.
    qkv = jnp.dot(x, wqkv_ref[...], preferred_element_type=jnp.float32) + bqkv_ref[...]
    for h in range(num_heads):                       # static unroll over heads
        q_h = qkv[:, h * head_dim:(h + 1) * head_dim] * scale       # fold 1/sqrt(Dh)
        k_h = qkv[:, D + h * head_dim:D + (h + 1) * head_dim]
        v_h = qkv[:, 2 * D + h * head_dim:2 * D + (h + 1) * head_dim]
        q_ref[h] = q_h.astype(q_ref.dtype)
        # Transpose K once here so every query tile later does a plain
        # (TQ,Dh)x(Dh,S) dot with no per-tile XLU transpose.
        kT_ref[h] = k_h.astype(kT_ref.dtype).T
        v_ref[h] = v_h.astype(v_ref.dtype)


# --------------------------------------------------------------------------
# Stage 2: attention (per-head loop) + output projection + FFN + 2x LayerNorm.
# --------------------------------------------------------------------------
def _encoder_kernel(x_ref,                           # (TQ, D) residual / query rows
                    q_ref, kT_ref, v_ref,            # (H,TQ,Dh), (H,Dh,S), (H,S,Dh)
                    wo_ref, bo_ref,                  # (H,Dh,D), (1,D)
                    g_mha_ref, b_mha_ref,            # (1,D)
                    w1_ref, b1_ref, w2_ref, b2_ref,  # (D,F),(1,F),(F,D),(1,D)
                    g_ffn_ref, b_ffn_ref,            # (1,D)
                    o_ref,                           # (TQ, D)
                    *, compute_dtype, approx_softmax):
    cdt = compute_dtype
    TQ, D = x_ref.shape
    H = q_ref.shape[0]

    # ---- Attention: loop heads so only one (TQ, S) block is live at a time;
    #      fold head-concat + output projection into an MXU accumulation. ----
    # TODO(synk): attention mask path not implemented (forward uses mask=None).
    acc = jnp.zeros((TQ, D), jnp.float32)
    for h in range(H):
        s = jnp.dot(q_ref[h], kT_ref[h],
                    preferred_element_type=jnp.float32)             # (TQ, S)
        s = s - jnp.max(s, axis=-1, keepdims=True)
        p = jnp.exp(s)
        denom = jnp.sum(p, axis=-1, keepdims=True)
        if approx_softmax:
            p = p * pl.reciprocal(denom, approx=True)                # EUP slot
        else:
            p = p / denom
        o_h = jnp.dot(p.astype(cdt), v_ref[h],
                      preferred_element_type=jnp.float32)            # (TQ, Dh)
        acc = acc + jnp.dot(o_h.astype(cdt), wo_ref[h],
                            preferred_element_type=jnp.float32)      # (TQ, D)

    mha = acc + bo_ref[...]

    # ---- Residual + LayerNorm (post-MHA), f32 math. ----
    x1 = _layer_norm(x_ref[...].astype(jnp.float32) + mha,
                     g_mha_ref[...], b_mha_ref[...])

    # ---- FFN: Linear -> ReLU -> Linear. ----
    h1 = jnp.dot(x1.astype(cdt), w1_ref[...],
                 preferred_element_type=jnp.float32) + b1_ref[...]
    h1 = jnp.maximum(h1, 0.0)
    ffn = jnp.dot(h1.astype(cdt), w2_ref[...],
                  preferred_element_type=jnp.float32) + b2_ref[...]

    # ---- Residual + LayerNorm (post-FFN). ----
    o_ref[...] = _layer_norm(x1 + ffn, g_ffn_ref[...],
                             b_ffn_ref[...]).astype(o_ref.dtype)


def encoder_layer(x, params, num_heads, *, compute_dtype=jnp.float32,
                  approx_softmax=True):
    B, S, D = x.shape
    F = params["w1"].shape[1]
    H = num_heads
    Dh = D // H
    assert H * Dh == D
    cdt = compute_dtype
    scale = 1.0 / (Dh ** 0.5)

    TS = _pick_tile(S)        # sequence tile for the QKV projection
    TQ = _pick_tile(S)        # query tile for attention + FFN
    vmem_limit = _vmem_limit_bytes()

    # Host-side weight packing (free): one wide (D, 3D) QKV weight; wo rows are
    # already head-major so (H, Dh, D) is a plain reshape.
    wqkv = jnp.concatenate(
        [params["wq"], params["wk"], params["wv"]], axis=1).astype(cdt)
    bqkv = jnp.concatenate(
        [params["bq"], params["bk"], params["bv"]]).reshape(1, 3 * D)
    wo = params["wo"].reshape(H, Dh, D).astype(cdt)
    bo = params["bo"].reshape(1, D)
    w1 = params["w1"].astype(cdt); b1 = params["b1"].reshape(1, F)
    w2 = params["w2"].astype(cdt); b2 = params["b2"].reshape(1, D)
    g_mha = params["g_mha"].reshape(1, D); b_mha = params["b_mha"].reshape(1, D)
    g_ffn = params["g_ffn"].reshape(1, D); b_ffn = params["b_ffn"].reshape(1, D)

    def const(shape):
        nd = len(shape)
        return pl.BlockSpec(shape, lambda i, j, _nd=nd: (0,) * _nd)

    # ---------------- Stage 1: QKV projection ----------------
    q_hm, kT_hm, v_hm = pl.pallas_call(
        functools.partial(_qkv_kernel, num_heads=H, head_dim=Dh,
                          scale=scale, compute_dtype=cdt),
        out_shape=(
            jax.ShapeDtypeStruct((B, H, S, Dh), cdt),   # Q (pre-scaled)
            jax.ShapeDtypeStruct((B, H, Dh, S), cdt),   # K^T
            jax.ShapeDtypeStruct((B, H, S, Dh), cdt),   # V
        ),
        grid_spec=pltpu.PrefetchScalarGridSpec(
            num_scalar_prefetch=0,
            grid=(B, S // TS),
            in_specs=[
                pl.BlockSpec((pl.Squeezed(), TS, D), lambda b, s: (b, s, 0)),
                const((D, 3 * D)),
                const((1, 3 * D)),
            ],
            out_specs=(
                pl.BlockSpec((pl.Squeezed(), H, TS, Dh), lambda b, s: (b, 0, s, 0)),
                pl.BlockSpec((pl.Squeezed(), H, Dh, TS), lambda b, s: (b, 0, 0, s)),
                pl.BlockSpec((pl.Squeezed(), H, TS, Dh), lambda b, s: (b, 0, s, 0)),
            ),
        ),
        compiler_params=pltpu.CompilerParams(
            dimension_semantics=("parallel", "parallel"),
            vmem_limit_bytes=vmem_limit,
        ),
    )(x, wqkv, bqkv)

    # ---------------- Stage 2: attention + FFN + LayerNorms ----------------
    return pl.pallas_call(
        functools.partial(_encoder_kernel, compute_dtype=cdt,
                          approx_softmax=approx_softmax),
        out_shape=jax.ShapeDtypeStruct((B, S, D), x.dtype),
        grid_spec=pltpu.PrefetchScalarGridSpec(
            num_scalar_prefetch=0,
            grid=(B, S // TQ),
            in_specs=[
                pl.BlockSpec((pl.Squeezed(), TQ, D), lambda b, t: (b, t, 0)),         # x tile
                pl.BlockSpec((pl.Squeezed(), H, TQ, Dh), lambda b, t: (b, 0, t, 0)),  # Q tile
                pl.BlockSpec((pl.Squeezed(), H, Dh, S), lambda b, t: (b, 0, 0, 0)),   # K^T (full seq)
                pl.BlockSpec((pl.Squeezed(), H, S, Dh), lambda b, t: (b, 0, 0, 0)),   # V   (full seq)
                const((H, Dh, D)), const((1, D)),     # wo, bo
                const((1, D)), const((1, D)),         # ln_mha gamma, beta
                const((D, F)), const((1, F)),         # ffn w1, b1
                const((F, D)), const((1, D)),         # ffn w2, b2
                const((1, D)), const((1, D)),         # ln_ffn gamma, beta
            ],
            out_specs=pl.BlockSpec((pl.Squeezed(), TQ, D), lambda b, t: (b, t, 0)),
        ),
        compiler_params=pltpu.CompilerParams(
            dimension_semantics=("parallel", "parallel"),
            vmem_limit_bytes=vmem_limit,
        ),
    )(x, q_hm, kT_hm, v_hm, wo, bo, g_mha, b_mha,
      w1, b1, w2, b2, g_ffn, b_ffn)


def init_params(key, d_model, d_ff):
    ks = jax.random.split(key, 12)
    s = 0.02
    return {
        "wq": s * jax.random.normal(ks[0], (d_model, d_model), jnp.float32),
        "bq": s * jax.random.normal(ks[1], (d_model,), jnp.float32),
        "wk": s * jax.random.normal(ks[2], (d_model, d_model), jnp.float32),
        "bk": s * jax.random.normal(ks[3], (d_model,), jnp.float32),
        "wv": s * jax.random.normal(ks[4], (d_model, d_model), jnp.float32),
        "bv": s * jax.random.normal(ks[5], (d_model,), jnp.float32),
        "wo": s * jax.random.normal(ks[6], (d_model, d_model), jnp.float32),
        "bo": s * jax.random.normal(ks[7], (d_model,), jnp.float32),
        "w1": s * jax.random.normal(ks[8], (d_model, d_ff), jnp.float32),
        "b1": s * jax.random.normal(ks[9], (d_ff,), jnp.float32),
        "w2": s * jax.random.normal(ks[10], (d_ff, d_model), jnp.float32),
        "b2": s * jax.random.normal(ks[11], (d_model,), jnp.float32),
        # LayerNorm params at PyTorch defaults (gamma=1, beta=0)
        "g_mha": jnp.ones((d_model,), jnp.float32),
        "b_mha": jnp.zeros((d_model,), jnp.float32),
        "g_ffn": jnp.ones((d_model,), jnp.float32),
        "b_ffn": jnp.zeros((d_model,), jnp.float32),
    }


def _reference(x, p, num_heads):
    """Pure-JAX reference (mirrors the PyTorch module)."""
    B, S, D = x.shape
    Dh = D // num_heads

    def ln(v, g, b, eps=1e-5):
        mu = v.mean(-1, keepdims=True)
        var = ((v - mu) ** 2).mean(-1, keepdims=True)
        return (v - mu) / jnp.sqrt(var + eps) * g + b

    q = x @ p["wq"] + p["bq"]
    k = x @ p["wk"] + p["bk"]
    v = x @ p["wv"] + p["bv"]
    q = q.reshape(B, S, num_heads, Dh).transpose(0, 2, 1, 3)
    k = k.reshape(B, S, num_heads, Dh).transpose(0, 2, 1, 3)
    v = v.reshape(B, S, num_heads, Dh).transpose(0, 2, 1, 3)
    s = jnp.einsum("bhqd,bhkd->bhqk", q, k) / jnp.sqrt(Dh)
    pmat = jax.nn.softmax(s, axis=-1)
    a = jnp.einsum("bhqk,bhkd->bhqd", pmat, v).transpose(0, 2, 1, 3).reshape(B, S, D)
    mha = a @ p["wo"] + p["bo"]
    x1 = ln(x + mha, p["g_mha"], p["b_mha"])
    ffn = jnp.maximum(x1 @ p["w1"] + p["b1"], 0.0) @ p["w2"] + p["b2"]
    return ln(x1 + ffn, p["g_ffn"], p["b_ffn"])


if __name__ == "__main__":
    B, S, D, H, F = 2, 8, 32, 4, 64
    key = jax.random.PRNGKey(0)
    kx, kp = jax.random.split(key)
    x = jax.random.normal(kx, (B, S, D), jnp.float32)
    params = init_params(kp, D, F)

    ref = _reference(x, params, H)

    # f32 path: tight parity with the PyTorch-equivalent reference.
    out = jax.block_until_ready(
        encoder_layer(x, params, H, compute_dtype=jnp.float32))
    assert out.shape == (B, S, D)
    err = jnp.max(jnp.abs(out - ref))
    assert jnp.allclose(out, ref, atol=1e-3, rtol=1e-3), f"f32 max err {err}"

    # bf16 path (recommended on v6e/v7x): looser tolerance, expected numerics shift.
    out_bf16 = jax.block_until_ready(
        encoder_layer(x, params, H, compute_dtype=jnp.bfloat16))
    err_bf16 = jnp.max(jnp.abs(out_bf16 - ref))
    assert jnp.allclose(out_bf16, ref, atol=3e-2, rtol=3e-2), f"bf16 max err {err_bf16}"

    print("KERNEL_OK")
</pallas_src>

<mosaic_0001>
module attributes {stable_mosaic.version = 11 : i64} {
  func.func @_qkv_kernel(%arg0: i32, %arg1: i32, %arg2: memref<1x8x32xf32, #tpu.memory_space<vmem>>, %arg3: memref<32x96xf32, #tpu.memory_space<vmem>>, %arg4: memref<1x96xf32, #tpu.memory_space<vmem>>, %arg5: memref<1x4x8x8xf32, #tpu.memory_space<vmem>>, %arg6: memref<1x4x8x8xf32, #tpu.memory_space<vmem>>, %arg7: memref<1x4x8x8xf32, #tpu.memory_space<vmem>>) attributes {dimension_semantics = [#tpu.dimension_semantics<parallel>, #tpu.dimension_semantics<parallel>], iteration_bounds = array<i64: 2, 1>, scalar_prefetch = 0 : i64, scratch_operands = 0 : i64, tpu.core_type = #tpu.core_type<tc>, window_params = [{transform_indices = @transform_0, window_bounds = array<i64: 1, 8, 32>}, {pipeline_mode = #tpu.pipeline_mode<synchronous>, transform_indices = @transform_1, window_bounds = array<i64: 32, 96>}, {pipeline_mode = #tpu.pipeline_mode<synchronous>, transform_indices = @transform_2, window_bounds = array<i64: 1, 96>}, {transform_indices = @transform_3, window_bounds = array<i64: 1, 4, 8, 8>}, {transform_indices = @transform_4, window_bounds = array<i64: 1, 4, 8, 8>}, {transform_indices = @transform_5, window_bounds = array<i64: 1, 4, 8, 8>}]} {
    %c0 = arith.constant 0 : index
    %c0_0 = arith.constant 0 : index
    %c0_1 = arith.constant 0 : index
    %0 = vector.load %arg2[%c0, %c0_0, %c0_1] : memref<1x8x32xf32, #tpu.memory_space<vmem>>, vector<1x8x32xf32>
    %1 = vector.shape_cast %0 : vector<1x8x32xf32> to vector<8x32xf32>
    %c0_2 = arith.constant 0 : index
    %c0_3 = arith.constant 0 : index
    %2 = vector.load %arg3[%c0_2, %c0_3] : memref<32x96xf32, #tpu.memory_space<vmem>>, vector<32x96xf32>
    %cst = arith.constant dense<0.000000e+00> : vector<8x96xf32>
    %3 = tpu.matmul %1, %2, %cst {dimension_numbers = #tpu.dot_dimension_numbers<[1], [0], [0], [1], [0, 0, 1, 1], [], []>} : vector<8x32xf32>, vector<32x96xf32>, vector<8x96xf32> -> vector<8x96xf32>
    %c0_4 = arith.constant 0 : index
    %c0_5 = arith.constant 0 : index
    %4 = vector.load %arg4[%c0_4, %c0_5] : memref<1x96xf32, #tpu.memory_space<vmem>>, vector<1x96xf32>
    %5 = vector.broadcast %4 : vector<1x96xf32> to vector<8x96xf32>
    %6 = arith.addf %3, %5 : vector<8x96xf32>
    %7 = vector.extract_strided_slice %6 {offsets = [0, 0], sizes = [8, 8], strides = [1, 1]} : vector<8x96xf32> to vector<8x8xf32>
    %cst_6 = arith.constant 0.353553385 : f32
    %8 = vector.broadcast %cst_6 : f32 to vector<8x8xf32>
    %9 = arith.mulf %7, %8 : vector<8x8xf32>
    %10 = vector.extract_strided_slice %6 {offsets = [0, 32], sizes = [8, 8], strides = [1, 1]} : vector<8x96xf32> to vector<8x8xf32>
    %11 = vector.extract_strided_slice %6 {offsets = [0, 64], sizes = [8, 8], strides = [1, 1]} : vector<8x96xf32> to vector<8x8xf32>
    %c0_7 = arith.constant 0 : index
    %c0_8 = arith.constant 0 : index
    %c0_9 = arith.constant 0 : index
    %c0_10 = arith.constant 0 : index
    %12 = vector.load %arg5[%c0_7, %c0_8, %c0_9, %c0_10] : memref<1x4x8x8xf32, #tpu.memory_space<vmem>>, vector<1x1x8x8xf32>
    %13 = vector.shape_cast %12 : vector<1x1x8x8xf32> to vector<8x8xf32>
    %14 = vector.shape_cast %9 : vector<8x8xf32> to vector<1x1x8x8xf32>
    tpu.vector_store %arg5[%c0_7, %c0_8, %c0_9, %c0_10], %14 {strides = array<i32>} : memref<1x4x8x8xf32, #tpu.memory_space<vmem>>, vector<1x1x8x8xf32>,
    %15 = tpu.transpose %10, [1, 0] : vector<8x8xf32> -> vector<8x8xf32>
    %c0_11 = arith.constant 0 : index
    %c0_12 = arith.constant 0 : index
    %c0_13 = arith.constant 0 : index
    %c0_14 = arith.constant 0 : index
    %16 = vector.load %arg6[%c0_11, %c0_12, %c0_13, %c0_14] : memref<1x4x8x8xf32, #tpu.memory_space<vmem>>, vector<1x1x8x8xf32>
    %17 = vector.shape_cast %16 : vector<1x1x8x8xf32> to vector<8x8xf32>
    %18 = vector.shape_cast %15 : vector<8x8xf32> to vector<1x1x8x8xf32>
    tpu.vector_store %arg6[%c0_11, %c0_12, %c0_13, %c0_14], %18 {strides = array<i32>} : memref<1x4x8x8xf32, #tpu.memory_space<vmem>>, vector<1x1x8x8xf32>,
    %c0_15 = arith.constant 0 : index
    %c0_16 = arith.constant 0 : index
    %c0_17 = arith.constant 0 : index
    %c0_18 = arith.constant 0 : index
    %19 = vector.load %arg7[%c0_15, %c0_16, %c0_17, %c0_18] : memref<1x4x8x8xf32, #tpu.memory_space<vmem>>, vector<1x1x8x8xf32>
    %20 = vector.shape_cast %19 : vector<1x1x8x8xf32> to vector<8x8xf32>
    %21 = vector.shape_cast %11 : vector<8x8xf32> to vector<1x1x8x8xf32>
    tpu.vector_store %arg7[%c0_15, %c0_16, %c0_17, %c0_18], %21 {strides = array<i32>} : memref<1x4x8x8xf32, #tpu.memory_space<vmem>>, vector<1x1x8x8xf32>,
    %22 = vector.extract_strided_slice %6 {offsets = [0, 8], sizes = [8, 8], strides = [1, 1]} : vector<8x96xf32> to vector<8x8xf32>
    %cst_19 = arith.constant 0.353553385 : f32
    %23 = vector.broadcast %cst_19 : f32 to vector<8x8xf32>
    %24 = arith.mulf %22, %23 : vector<8x8xf32>
    %25 = vector.extract_strided_slice %6 {offsets = [0, 40], sizes = [8, 8], strides = [1, 1]} : vector<8x96xf32> to vector<8x8xf32>
    %26 = vector.extract_strided_slice %6 {offsets = [0, 72], sizes = [8, 8], strides = [1, 1]} : vector<8x96xf32> to vector<8x8xf32>
    %c0_20 = arith.constant 0 : index
    %c1 = arith.constant 1 : index
    %c0_21 = arith.constant 0 : index
    %c0_22 = arith.constant 0 : index
    %27 = vector.load %arg5[%c0_20, %c1, %c0_21, %c0_22] : memref<1x4x8x8xf32, #tpu.memory_space<vmem>>, vector<1x1x8x8xf32>
    %28 = vector.shape_cast %27 : vector<1x1x8x8xf32> to vector<8x8xf32>
    %29 = vector.shape_cast %24 : vector<8x8xf32> to vector<1x1x8x8xf32>
    tpu.vector_store %arg5[%c0_20, %c1, %c0_21, %c0_22], %29 {strides = array<i32>} : memref<1x4x8x8xf32, #tpu.memory_space<vmem>>, vector<1x1x8x8xf32>,
    %30 = tpu.transpose %25, [1, 0] : vector<8x8xf32> -> vector<8x8xf32>
    %c0_23 = arith.constant 0 : index
    %c1_24 = arith.constant 1 : index
    %c0_25 = arith.constant 0 : index
    %c0_26 = arith.constant 0 : index
    %31 = vector.load %arg6[%c0_23, %c1_24, %c0_25, %c0_26] : memref<1x4x8x8xf32, #tpu.memory_space<vmem>>, vector<1x1x8x8xf32>
    %32 = vector.shape_cast %31 : vector<1x1x8x8xf32> to vector<8x8xf32>
    %33 = vector.shape_cast %30 : vector<8x8xf32> to vector<1x1x8x8xf32>
    tpu.vector_store %arg6[%c0_23, %c1_24, %c0_25, %c0_26], %33 {strides = array<i32>} : memref<1x4x8x8xf32, #tpu.memory_space<vmem>>, vector<1x1x8x8xf32>,
    %c0_27 = arith.constant 0 : index
    %c1_28 = arith.constant 1 : index
    %c0_29 = arith.constant 0 : index
    %c0_30 = arith.constant 0 : index
    %34 = vector.load %arg7[%c0_27, %c1_28, %c0_29, %c0_30] : memref<1x4x8x8xf32, #tpu.memory_space<vmem>>, vector<1x1x8x8xf32>
    %35 = vector.shape_cast %34 : vector<1x1x8x8xf32> to vector<8x8xf32>
    %36 = vector.shape_cast %26 : vector<8x8xf32> to vector<1x1x8x8xf32>
    tpu.vector_store %arg7[%c0_27, %c1_28, %c0_29, %c0_30], %36 {strides = array<i32>} : memref<1x4x8x8xf32, #tpu.memory_space<vmem>>, vector<1x1x8x8xf32>,
    %37 = vector.extract_strided_slice %6 {offsets = [0, 16], sizes = [8, 8], strides = [1, 1]} : vector<8x96xf32> to vector<8x8xf32>
    %cst_31 = arith.constant 0.353553385 : f32
    %38 = vector.broadcast %cst_31 : f32 to vector<8x8xf32>
    %39 = arith.mulf %37, %38 : vector<8x8xf32>
    %40 = vector.extract_strided_slice %6 {offsets = [0, 48], sizes = [8, 8], strides = [1, 1]} : vector<8x96xf32> to vector<8x8xf32>
    %41 = vector.extract_strided_slice %6 {offsets = [0, 80], sizes = [8, 8], strides = [1, 1]} : vector<8x96xf32> to vector<8x8xf32>
    %c0_32 = arith.constant 0 : index
    %c2 = arith.constant 2 : index
    %c0_33 = arith.constant 0 : index
    %c0_34 = arith.constant 0 : index
    %42 = vector.load %arg5[%c0_32, %c2, %c0_33, %c0_34] : memref<1x4x8x8xf32, #tpu.memory_space<vmem>>, vector<1x1x8x8xf32>
    %43 = vector.shape_cast %42 : vector<1x1x8x8xf32> to vector<8x8xf32>
    %44 = vector.shape_cast %39 : vector<8x8xf32> to vector<1x1x8x8xf32>
    tpu.vector_store %arg5[%c0_32, %c2, %c0_33, %c0_34], %44 {strides = array<i32>} : memref<1x4x8x8xf32, #tpu.memory_space<vmem>>, vector<1x1x8x8xf32>,
    %45 = tpu.transpose %40, [1, 0] : vector<8x8xf32> -> vector<8x8xf32>
    %c0_35 = arith.constant 0 : index
    %c2_36 = arith.constant 2 : index
    %c0_37 = arith.constant 0 : index
    %c0_38 = arith.constant 0 : index
    %46 = vector.load %arg6[%c0_35, %c2_36, %c0_37, %c0_38] : memref<1x4x8x8xf32, #tpu.memory_space<vmem>>, vector<1x1x8x8xf32>
    %47 = vector.shape_cast %46 : vector<1x1x8x8xf32> to vector<8x8xf32>
    %48 = vector.shape_cast %45 : vector<8x8xf32> to vector<1x1x8x8xf32>
    tpu.vector_store %arg6[%c0_35, %c2_36, %c0_37, %c0_38], %48 {strides = array<i32>} : memref<1x4x8x8xf32, #tpu.memory_space<vmem>>, vector<1x1x8x8xf32>,
    %c0_39 = arith.constant 0 : index
    %c2_40 = arith.constant 2 : index
    %c0_41 = arith.constant 0 : index
    %c0_42 = arith.constant 0 : index
    %49 = vector.load %arg7[%c0_39, %c2_40, %c0_41, %c0_42] : memref<1x4x8x8xf32, #tpu.memory_space<vmem>>, vector<1x1x8x8xf32>
    %50 = vector.shape_cast %49 : vector<1x1x8x8xf32> to vector<8x8xf32>
    %51 = vector.shape_cast %41 : vector<8x8xf32> to vector<1x1x8x8xf32>
    tpu.vector_store %arg7[%c0_39, %c2_40, %c0_41, %c0_42], %51 {strides = array<i32>} : memref<1x4x8x8xf32, #tpu.memory_space<vmem>>, vector<1x1x8x8xf32>,
    %52 = vector.extract_strided_slice %6 {offsets = [0, 24], sizes = [8, 8], strides = [1, 1]} : vector<8x96xf32> to vector<8x8xf32>
    %cst_43 = arith.constant 0.353553385 : f32
    %53 = vector.broadcast %cst_43 : f32 to vector<8x8xf32>
    %54 = arith.mulf %52, %53 : vector<8x8xf32>
    %55 = vector.extract_strided_slice %6 {offsets = [0, 56], sizes = [8, 8], strides = [1, 1]} : vector<8x96xf32> to vector<8x8xf32>
    %56 = vector.extract_strided_slice %6 {offsets = [0, 88], sizes = [8, 8], strides = [1, 1]} : vector<8x96xf32> to vector<8x8xf32>
    %c0_44 = arith.constant 0 : index
    %c3 = arith.constant 3 : index
    %c0_45 = arith.constant 0 : index
    %c0_46 = arith.constant 0 : index
    %57 = vector.load %arg5[%c0_44, %c3, %c0_45, %c0_46] : memref<1x4x8x8xf32, #tpu.memory_space<vmem>>, vector<1x1x8x8xf32>
    %58 = vector.shape_cast %57 : vector<1x1x8x8xf32> to vector<8x8xf32>
    %59 = vector.shape_cast %54 : vector<8x8xf32> to vector<1x1x8x8xf32>
    tpu.vector_store %arg5[%c0_44, %c3, %c0_45, %c0_46], %59 {strides = array<i32>} : memref<1x4x8x8xf32, #tpu.memory_space<vmem>>, vector<1x1x8x8xf32>,
    %60 = tpu.transpose %55, [1, 0] : vector<8x8xf32> -> vector<8x8xf32>
    %c0_47 = arith.constant 0 : index
    %c3_48 = arith.constant 3 : index
    %c0_49 = arith.constant 0 : index
    %c0_50 = arith.constant 0 : index
    %61 = vector.load %arg6[%c0_47, %c3_48, %c0_49, %c0_50] : memref<1x4x8x8xf32, #tpu.memory_space<vmem>>, vector<1x1x8x8xf32>
    %62 = vector.shape_cast %61 : vector<1x1x8x8xf32> to vector<8x8xf32>
    %63 = vector.shape_cast %60 : vector<8x8xf32> to vector<1x1x8x8xf32>
    tpu.vector_store %arg6[%c0_47, %c3_48, %c0_49, %c0_50], %63 {strides = array<i32>} : memref<1x4x8x8xf32, #tpu.memory_space<vmem>>, vector<1x1x8x8xf32>,
    %c0_51 = arith.constant 0 : index
    %c3_52 = arith.constant 3 : index
    %c0_53 = arith.constant 0 : index
    %c0_54 = arith.constant 0 : index
    %64 = vector.load %arg7[%c0_51, %c3_52, %c0_53, %c0_54] : memref<1x4x8x8xf32, #tpu.memory_space<vmem>>, vector<1x1x8x8xf32>
    %65 = vector.shape_cast %64 : vector<1x1x8x8xf32> to vector<8x8xf32>
    %66 = vector.shape_cast %56 : vector<8x8xf32> to vector<1x1x8x8xf32>
    tpu.vector_store %arg7[%c0_51, %c3_52, %c0_53, %c0_54], %66 {strides = array<i32>} : memref<1x4x8x8xf32, #tpu.memory_space<vmem>>, vector<1x1x8x8xf32>,
    return
  }
  func.func @transform_0(%arg0: i32, %arg1: i32) -> (i32, i32, i32) {
    %c0_i32 = arith.constant 0 : i32
    %c0_i32_0 = arith.constant 0 : i32
    return %arg0, %arg1, %c0_i32 : i32, i32, i32
  }
  func.func @transform_1(%arg0: i32, %arg1: i32) -> (i32, i32) {
    %c0_i32 = arith.constant 0 : i32
    %c0_i32_0 = arith.constant 0 : i32
    %c0_i32_1 = arith.constant 0 : i32
    return %c0_i32, %c0_i32_0 : i32, i32
  }
  func.func @transform_2(%arg0: i32, %arg1: i32) -> (i32, i32) {
    %c0_i32 = arith.constant 0 : i32
    %c0_i32_0 = arith.constant 0 : i32
    %c0_i32_1 = arith.constant 0 : i32
    return %c0_i32, %c0_i32_0 : i32, i32
  }
  func.func @transform_3(%arg0: i32, %arg1: i32) -> (i32, i32, i32, i32) {
    %c0_i32 = arith.constant 0 : i32
    %c0_i32_0 = arith.constant 0 : i32
    %c0_i32_1 = arith.constant 0 : i32
    return %arg0, %c0_i32, %arg1, %c0_i32_0 : i32, i32, i32, i32
  }
  func.func @transform_4(%arg0: i32, %arg1: i32) -> (i32, i32, i32, i32) {
    %c0_i32 = arith.constant 0 : i32
    %c0_i32_0 = arith.constant 0 : i32
    %c0_i32_1 = arith.constant 0 : i32
    return %arg0, %c0_i32, %c0_i32_0, %arg1 : i32, i32, i32, i32
  }
  func.func @transform_5(%arg0: i32, %arg1: i32) -> (i32, i32, i32, i32) {
    %c0_i32 = arith.constant 0 : i32
    %c0_i32_0 = arith.constant 0 : i32
    %c0_i32_1 = arith.constant 0 : i32
    return %arg0, %c0_i32, %arg1, %c0_i32_0 : i32, i32, i32, i32
  }
}

</mosaic_0001>

<bundles_post_ra>
// kernel: tpu_custom_call.1
= control target key start
LH: loop header
LB: loop body
LE: loop exit
PB: predicated region body
PF: predicated region fallthrough
CT: control target
= control target key end

     0   :  { %11 = vsyncpa [#allocation3], 0  ;;  %s1530_s0 = inlined_call_operand.hbm [shape: f32[2,8,32], index: 0, kind: input, shape index: {}]   ;;  %s1531_s1 = inlined_call_operand.hbm [shape: f32[32,96], index: 1, kind: input, shape index: {}]   ;;  %s1532_s2 = inlined_call_operand.vmem [shape: f32[1,96], index: 2, kind: input, shape index: {}]   ;;  %s1533_s3 = inlined_call_operand.hbm [shape: f32[2,4,8,8], index: 3, kind: output, shape index: {0}]   ;;  %s1534_s4 = inlined_call_operand.hbm [shape: f32[2,4,8,8], index: 4, kind: output, shape index: {1}]   ;;  %s1535_s5 = inlined_call_operand.hbm [shape: f32[2,4,8,8], index: 5, kind: output, shape index: {2}]  }
   0x1   :  { %13 = vsyncpa [#allocation3 + $0x1], 0 }
   0x2   :  { %14 = vsyncpa [#allocation6], 0 }
   0x3   :  { %15 = vsyncpa [#allocation4], 0 }
   0x4   :  { %17 = vsyncpa [#allocation4 + $0x1], 0 }
   0x5   :  { %18 = vsyncpa [#allocation9], 0 }
   0x6   :  { %20 = vsyncpa [#allocation9 + $0x1], 0  ;;  %s1204_s18 = smov 0   ;;  %s1206_s19 = smov 0  }
   0x7   :  { %s1208_s20 = smov 0   ;;  %s1210_s21 = smov 0  }
   0x8   :  { %s1212_s22 = smov 0   ;;  %s1214_s23 = smov 0  }
   0x9 LB: > { %s1235_s24 = sadd.s32 4294967295, %s1149_s23   ;;  %s1539_s25 = sadd.s32 4294967294, %s1149_s23   ;;  %s1149_s23 = sphi %s1214_s23, %s26_s23   ;;  %s1145_s22 = sphi %s1212_s22, %s1559_s22   ;;  %s1141_s21 = sphi %s1210_s21, %s1558_s21   ;;  %s1137_s20 = sphi %s1208_s20, %s1557_s20   ;;  %s1133_s19 = sphi %s1206_s19, %s1556_s19   ;;  %s1129_s18 = sphi %s1204_s18, %s1555_s18  }
   0xa   : > { %p60_p0 = scmp.ne.s32.totalorder %s1133_s19, %s1129_s18  ;;  %p1536_p1 = scmp.eq.s32.totalorder %s1235_s24, 0 }
   0xb   : > { %p134_p3 = scmp.eq.s32.totalorder %s1539_s25, 1  ;;  %p786_p5 = scmp.ge.s32.totalorder %s1149_s23, 1 }
   0xc   : > { %p1246_p4 = por %p1536_p1, %p60_p0  ;;  %p197_p7 = scmp.lt.s32.totalorder %s1149_s23, 3 }
   0xd   : > { %p1251_p6 = por %p134_p3, %p60_p0  ;;  %s1151_s29 = smov [#allocation5]  }
   0xe   : > { %s1540_s26 = scalar_select %p1246_p4, 1, 0 }
   0xf   : > { %s1541_s27 = scalar_select %p1251_p6, 1, 0 }
  0x10   : > { %p1256_p8 = pnand %p786_p5, %p197_p7  ;;  %s209_s30 = sshll.u32 %s1151_s29, 4  ;;  %s210_s30 = int_to_ptr.vmem [resolvable:$true] %s209_s30 }
  0x11   : > { %s38_s7 = sadd.s32 1, %s1145_s22  ;;  %s945_s10 = scalar_lea.hbm %s1531_s1, 512 }
  0x12   : > { %s1542_s28 = scalar_select %p1256_p8, 1, 0 }
  0x13   : > { %p856_p9 = pneg %p1256_p8  ;;  %p946_p12 = scmp.ne.s32.totalorder %s1531_s1, %s945_s10 }
  0x14   : > { %p952_p5 = scmp.lt.u32.totalorder %s945_s10, %s1531_s1 }
  0x15   : > { %p1265_p11 = pnand %p856_p9, %p1536_p1 }
  0x17   : > { %p947_p13 = pneg %p1265_p11 }
  0x19   : > { %p948_p0 = pnand %p947_p13, %p946_p12 }
  0x1b   : > { %p949_p3 = pneg %p948_p0 }
  0x1d   : > { %p954_p7 = pnand %p952_p5, %p949_p3 }
  0x1f   : > { %957 = shalt.err (!%p954_p7)
}
  0x20   : > { %s958_s15 = scalar_lea.vmem %s210_s30, 512  ;;  %p966_p2 = scmp.lt.s32.totalorder %s210_s30, %s210_s30 }
  0x21   : > { %p959_p9 = scmp.ne.s32.totalorder %s210_s30, %s958_s15  ;;  %p967_p6 = scmp.lt.s32.totalorder %s958_s15, %s958_s15 }
  0x23   : > { %p961_p10 = pnand %p959_p9, %p947_p13  ;;  %p968_p4 = por %p967_p6, %p966_p2 }
  0x25   : > { %p962_p1 = pneg %p961_p10 }
  0x27   : > { %p969_p8 = pnand %p968_p4, %p962_p1 }
  0x29   : > { %972 = shalt.err (!%p969_p8)
}
  0x2a   : > { %s1152_s16 = smov 128   ;;  %s1153_s17 = smov 8  }
  0x2b   : > { %859 = dma.hbm_to_vmem [thread:$0]  (!%p1265_p11), %s1531_s1, 512, %s210_s30, [#allocation6], %s1152_s16, %s1152_s16, %s1153_s17  }
  0x2c   : > { %p40_p1 = scmp.ge.s32.totalorder %s38_s7, 2  ;;  %s47_s9 = sadd.s32 1, %s1137_s20 }
  0x2d   : > { %p54_p2 = scmp.ne.s32.totalorder %s1137_s20, %s1133_s19  ;;  %p55_p4 = scmp.eq.s32.totalorder %s1149_s23, 0 }
  0x2e   : > { %s1561_s7 = smov (%p40_p1, %s38_s7), 0  ;;  %p1545_p8 = scmp.eq.s32.totalorder %s1235_s24, 1 }
  0x2f   : > { %p1292_p6 = por %p55_p4, %p54_p2  ;;  %s42_s6 = ssub.s32 %s1145_s22, %s1561_s7 }
  0x30   : > { %p1298_p10 = por %p1545_p8, %p54_p2  ;;  %p875_p12 = scmp.lt.s32.totalorder %s1149_s23, 2 }
  0x31   : > { %p45_p11 = scmp.eq.s32.totalorder %s42_s6, 0  ;;  %s226_s30 = sand.u32 1, %s1137_s20  }
  0x32   : > { %s789_s12 = sshll.u32 %s226_s30, 3  ;;  %s790_s14 = sshll.u32 %s1145_s22, 7 }
  0x33   : > { %s1307_s13 = scalar_select %p45_p11, %s1137_s20, %s47_s9  }
  0x34   : > { %s1313_s17 = scalar_lea.hbm %s1530_s0, %s790_s14  ;;  %s230_s29 = scalar_lea.vmem [#allocation2], %s789_s12 }
  0x35   : > { %s238_s8 = sshll.u32 %s230_s29, 4  ;;  %p1319_p13 = pnand %p875_p12, %p1292_p6  ;;  %s1315_s8 = int_to_ptr.vmem [resolvable:$true] %s238_s8 }
  0x36   : > { %s227_s9 = scalar_lea.sflag [#allocation3], %s226_s30  ;;  %s973_s25 = scalar_lea.hbm %s1313_s17, 128 }
  0x37   : > { %p974_p0 = scmp.ne.s32.totalorder %s1313_s17, %s973_s25  ;;  %p975_p3 = pneg %p1319_p13 }
  0x38   : > { %s978_s15 = scalar_lea.hbm %s1530_s0, 256  ;;  %p979_p9 = scmp.lt.u32.totalorder %s1313_s17, %s1530_s0 }
  0x39   : > { %p976_p5 = pnand %p975_p3, %p974_p0  ;;  %p980_p1 = scmp.lt.u32.totalorder %s978_s15, %s973_s25 }
  0x3a   : > { %p982_p4 = scmp.lt.u32.totalorder %s973_s25, %s1313_s17 }
  0x3b   : > { %p977_p7 = pneg %p976_p5  ;;  %p981_p2 = por %p980_p1, %p979_p9 }
  0x3d   : > { %p983_p6 = por %p982_p4, %p981_p2 }
  0x3f   : > { %p984_p8 = pnand %p983_p6, %p977_p7 }
  0x41   : > { %987 = shalt.err (!%p984_p8)
}
  0x42   : > { %s988_s30 = scalar_lea.vmem %s1315_s8, 128  ;;  %s1154_s29 = smov [#allocation2]  }
  0x43   : > { %p989_p12 = scmp.ne.s32.totalorder %s1315_s8, %s988_s30  ;;  %s993_s12 = sshll.u32 %s1154_s29, 4  ;;  %s994_s12 = int_to_ptr.vmem [resolvable:$false] %s993_s12 }
  0x44   : > { %s995_s14 = scalar_lea.vmem %s994_s12, 256  ;;  %p996_p5 = scmp.lt.s32.totalorder %s1315_s8, %s994_s12 }
  0x45   : > { %p991_p11 = pnand %p989_p12, %p975_p3  ;;  %p997_p9 = scmp.lt.s32.totalorder %s995_s14, %s988_s30 }
  0x47   : > { %p992_p0 = pneg %p991_p11  ;;  %p998_p1 = por %p997_p9, %p996_p5 }
  0x49   : > { %p999_p2 = pnand %p998_p1, %p992_p0 }
  0x4b   : > { %1002 = shalt.err (!%p999_p2)
}
  0x4c   : > { %863 = dma.hbm_to_vmem [thread:$0]  (!%p1319_p13), %s1313_s17, 128, %s1315_s8, %s227_s9  }
  0x4d   : > { %p1548_p7 = scmp.ne.s32.totalorder %s1542_s28, 0 }
  0x4e   : > { %s1351_s25 = sand.u32 (!%p1548_p7), 1, %s1133_s19   ;;  %p1549_p3 = scmp.ne.s32.totalorder (!%p1548_p7), %s1540_s26, 0 }
  0x4f   : > { %247 = sbr.rel (%p1548_p7) target bundleno = 602 (0x25a), region = 32  ;;  %s792_s15 = sshll.u32 (!%p1548_p7), %s1351_s25, 3 }
  0x50   : > { %s250_s10 = scalar_lea.sflag (!%p1548_p7), [#allocation3], %s1351_s25  ;;  %s253_s16 = scalar_lea.vmem (!%p1548_p7), [#allocation2], %s792_s15 }
  0x56   : > { %1112 = dma.done.wait (%p1549_p3), %s250_s10, 128  }
  0x57   : > { %1114 = vsyncadd (%p1549_p3), %s250_s10, 4294967168  ;;  %p1550_p4 = scmp.eq.s32.totalorder %s1235_s24, 0 }
  0x59   : > { %1116 = dma.done.wait (%p1550_p4), [#allocation6], 512   ;;  %p1551_p13 = pmov %p1550_p4 }
  0x5a   : > { %v1155_v0 = vmov 0.0|0.0   ;;  %vm1156_vm0 = vmmov 0   ;;  %v1157_v1 = vmov 0.0   ;;  %v295_v2 = vld [vmem:[#allocation5] sm:$0xff]  ;;  %v296_v3 = vld [vmem:[#allocation5 + $0x8] sm:$0xff]  ;;  %v297_v4 = vld [vmem:[#allocation5 + $0x10] sm:$0xff] }
  0x5b   : > { %1118 = vsyncadd (%p1551_p13), [#allocation6], 4294966784  ;;  %838 = vmatprep.subr.bf16.mxu0 %v1155_v0  ;;  %835 = vmatprep.mubr.msk.f32.mxu0 %vm1156_vm0, %v1157_v1  ;;  %v839_v5 = vpack.c.bf16 %v296_v3, %v295_v2  ;;  %v298_v6 = vld [vmem:[#allocation5 + $0x18] sm:$0xff]  ;;  %vm306_vm1 = vcmask 261120   ;;  %v797_v9 = vld [vmem:[%s1532_s2] ss:$0 sm:$0xff] }
  0x5c   : > { %v842_v7 = vpack.c.bf16 %v298_v6, %v297_v4  ;;  %v294_v8 = vld [vmem:[%s253_s16] sm:$0xff]  ;;  %s1367_s17 = sshll.u32 %s1351_s25, 5  ;;  %vm381_vm2 = vcmask 64512   ;;  %s1158_s8 = smov 64  }
  0x5d   : > { %840 = vmatpush3.bf16.msra.mxu0 %v839_v5  ;;  %s1159_s6 = smov 96   ;;  %s1370_s9 = scalar_lea.vmem [#allocation7], %s1367_s17 }
  0x5e   : > { %841 = vmatprep.subr.bf16.mxu0 %v1155_v0  ;;  %s1160_s30 = smov 88   ;;  %s1161_s29 = smov 56  }
  0x5f   : > { %s1162_s12 = smov 80   ;;  %s1163_s14 = smov 72  }
  0x60   : > { %s1164_s15 = smov 112   ;;  %s1165_s10 = smov 120  }
  0x61   : > { %843 = vmatpush3.bf16.msra.mxu0 %v842_v7  ;;  %s1166_s16 = smov 48   ;;  %s1167_s26 = smov 104  }
  0x62   : > { %s1168_s28 = smov 40  }
  0x64   : > { %836 = vmatmul.mubr.msk.f32.vlgmr.msra.gmra.mrb[0].mxu0 %vm306_vm1, %v294_v8 }
 0x137   : > { %v376_v10 = vpop.f32.mrb[0].mxu0 }
 0x138   : > { %v377_v11 = vadd.f32 %v797_v9, %v376_v10  ;;  %v837_v12 = vpop.f32.mrb[1].mxu0 }
 0x13a   : > { %420 = vrot.lane.b32.xlu1 %v377_v11, %s1158_s8  ;;  %384 = vrot.lane.b32.xlu0 %v377_v11, %s1159_s6  ;;  %v380_v13 = vmul.f32 0.35355338, %v377_v11  ;;  %s1375_s8 = scalar_lea.vmem [#allocation10], %s1367_s17  ;;  %s591_s6 = sshll.u32 %s1370_s9, 4  ;;  %s1389_s6 = int_to_ptr.vmem [resolvable:$true] %s591_s6 }
 0x13c   : > { %382 = vst.msk [vmem:[%s1370_s9] sm:$0xff] %vm381_vm2, %v380_v13 }
 0x13e   : > { %430 = vrot.lane.b32.xlu1 %v377_v11, %s1160_s30  ;;  %467 = vrot.lane.b32.xlu0 %v377_v11, %s1161_s29  ;;  %s1387_s30 = sshll.u32 %s1141_s21, 9  ;;  %s1169_s21 = smov [#allocation7]  }
 0x142   : > { %477 = vrot.lane.b32.xlu1 %v377_v11, %s1162_s12  ;;  %524 = vrot.lane.b32.xlu0 %v377_v11, %s1163_s14  ;;  %s1397_s14 = scalar_lea.hbm %s1533_s3, %s1387_s30 }
 0x146   : > { %472 = vrot.lane.b32.xlu0 %v380_v13, %s1164_s15  ;;  %425 = vrot.lane.b32.xlu1 %v380_v13, %s1165_s10  ;;  %s567_s15 = scalar_lea.sflag [#allocation4], %s1351_s25  ;;  %s1003_s10 = scalar_lea.vmem %s1389_s6, 512 }
 0x147   : > { %p1004_p6 = scmp.ne.s32.totalorder %s1389_s6, %s1003_s10 }
 0x149   : > { %p1005_p8 = pnand %p1004_p6, %p1298_p10 }
 0x14a   : > { %514 = vrot.lane.b32.xlu1 %v377_v11, %s1166_s16  ;;  %s1007_s16 = sshll.u32 %s1169_s21, 4  ;;  %s1008_s16 = int_to_ptr.vmem [resolvable:$false] %s1007_s16 }
 0x14b   : > { %p1006_p12 = pneg %p1005_p8  ;;  %p1010_p11 = scmp.lt.s32.totalorder %s1389_s6, %s1008_s16 }
 0x14e   : > { %519 = vrot.lane.b32.xlu1 %v380_v13, %s1167_s26  ;;  %s1009_s26 = scalar_lea.vmem %s1008_s16, 1024 }
 0x14f   : > { %p1011_p0 = scmp.lt.s32.totalorder %s1009_s26, %s1003_s10 }
 0x151   : > { %p1012_p5 = por %p1011_p0, %p1010_p11 }
 0x152   : > { %561 = vrot.lane.b32.xlu1 %v377_v11, %s1168_s28 }
 0x153   : > { %p1013_p9 = pnand %p1012_p5, %p1006_p12 }
 0x1ac   : > { %v421_v14 = vpop.permute.xlu1 %420  ;;  %v385_v15 = vpop.permute.xlu0 %384 }
 0x1ad   : > { %423 = vst.msk [vmem:[%s1375_s8] sm:$0xff] %vm381_vm2, %v421_v14  ;;  %387 = vxpose.xlu0.b32.start.end [1/1] (short) (narrow) %v385_v15, 8 }
 0x1b0   : > { %v431_v16 = vpop.permute.xlu1 %430  ;;  %v468_v17 = vpop.permute.xlu0 %467 }
 0x1b1   : > { %801 = vst.msk [vmem:[%s1375_s8 + $0x8] sm:$0xff] %vm381_vm2, %v468_v17  ;;  %433 = vxpose.xlu1.b32.start.end [1/1] (short) (narrow) %v431_v16, 8 }
 0x1b4   : > { %v478_v18 = vpop.permute.xlu1 %477  ;;  %v525_v19 = vpop.permute.xlu0 %524 }
 0x1b5   : > { %480 = vxpose.xlu0.b32.start.end [1/1] (short) (narrow) %v478_v18, 8  ;;  %527 = vxpose.xlu1.b32.start.end [1/1] (short) (narrow) %v525_v19, 8 }
 0x1b8   : > { %v473_v20 = vpop.permute.xlu0 %472  ;;  %v426_v21 = vpop.permute.xlu1 %425 }
 0x1b9   : > { %802 = vst.msk [vmem:[%s1370_s9 + $0x10] sm:$0xff] %vm381_vm2, %v473_v20  ;;  %799 = vst.msk [vmem:[%s1370_s9 + $0x8] sm:$0xff] %vm381_vm2, %v426_v21 }
 0x1bc   : > { %v515_v22 = vpop.permute.xlu1 %514 }
 0x1bd   : > { %804 = vst.msk [vmem:[%s1375_s8 + $0x10] sm:$0xff] %vm381_vm2, %v515_v22 }
 0x1c0   : > { %v520_v23 = vpop.permute.xlu1 %519 }
 0x1c1   : > { %805 = vst.msk [vmem:[%s1370_s9 + $0x18] sm:$0xff] %vm381_vm2, %v520_v23 }
 0x1c2   : > { %1016 = shalt.err (!%p1013_p9)
}
 0x1c3   : > { %s1017_s9 = scalar_lea.hbm %s1397_s14, 512  ;;  %s1021_s12 = scalar_lea.hbm %s1533_s3, 1024 }
 0x1c4   : > { %p1018_p1 = scmp.ne.s32.totalorder %s1397_s14, %s1017_s9  ;;  %p1022_p3 = scmp.lt.u32.totalorder %s1397_s14, %s1533_s3 }
 0x1c5   : > { %p1023_p4 = scmp.lt.u32.totalorder %s1021_s12, %s1017_s9  ;;  %p1025_p6 = scmp.lt.u32.totalorder %s1017_s9, %s1397_s14 }
 0x1c6   : > { %p1019_p2 = pnand %p1018_p1, %p1298_p10 }
 0x1c7   : > { %p1024_p13 = por %p1023_p4, %p1022_p3 }
 0x1c8   : > { %p1020_p7 = pneg %p1019_p2 }
 0x1c9   : > { %p1026_p8 = por %p1025_p6, %p1024_p13 }
 0x1cb   : > { %p1027_p12 = pnand %p1026_p8, %p1020_p7 }
 0x1cd   : > { %1030 = shalt.err (!%p1027_p12)
}
 0x1ce   : > { %s1170_s10 = smov 128   ;;  %s1171_s26 = smov 8   ;;  %v562_v24 = vpop.permute.xlu1 %561 }
 0x1cf   : > { %850 = dma.vmem_to_hbm [thread:$0]  (%p1298_p10), %s1389_s6, 512, %s1397_s14, %s567_s15, %s1170_s10, %s1170_s10, %s1171_s26  }
 0x1d0   : > { %807 = vst.msk [vmem:[%s1375_s8 + $0x18] sm:$0xff] %vm381_vm2, %v562_v24  ;;  %s286_s9 = scalar_lea.vmem [#allocation8], %s1367_s17  ;;  %s571_s29 = sand.u32 1, %s1235_s24  }
 0x1d1   : > { %s608_s28 = sshll.u32 %s286_s9, 4  ;;  %s625_s12 = sshll.u32 %s1375_s8, 4  ;;  %s1435_s28 = int_to_ptr.vmem [resolvable:$true] %s608_s28  ;;  %s1443_s12 = int_to_ptr.vmem [resolvable:$true] %s625_s12 }
 0x1d2   : > { %s1441_s6 = scalar_lea.hbm %s1534_s4, %s1387_s30  ;;  %s1449_s24 = scalar_lea.hbm %s1535_s5, %s1387_s30 }
 0x1d3   : > { %s1453_s8 = scalar_lea.sflag [#allocation9], %s571_s29  ;;  %s1031_s15 = scalar_lea.vmem %s1435_s28, 512 }
 0x1d4   : > { %p1032_p11 = scmp.ne.s32.totalorder %s1435_s28, %s1031_s15  ;;  %s1172_s16 = smov [#allocation8]  }
 0x1d5   : > { %s1035_s21 = sshll.u32 %s1172_s16, 4  ;;  %s1036_s21 = int_to_ptr.vmem [resolvable:$false] %s1035_s21 }
 0x1d6   : > { %p1033_p0 = pnand %p1032_p11, %p1298_p10  ;;  %s1037_s25 = scalar_lea.vmem %s1036_s21, 1024 }
 0x1d7   : > { %p1038_p9 = scmp.lt.s32.totalorder %s1435_s28, %s1036_s21  ;;  %p1039_p1 = scmp.lt.s32.totalorder %s1037_s25, %s1031_s15 }
 0x1d8   : > { %p1034_p5 = pneg %p1033_p0 }
 0x1d9   : > { %p1040_p2 = por %p1039_p1, %p1038_p9 }
 0x1db   : > { %p1041_p7 = pnand %p1040_p2, %p1034_p5 }
 0x22d   : > { %v403_v25 = vpop.trf.xlu0 }
 0x22e   : > { %419 = vst.msk [vmem:[%s286_s9] sm:$0xff] %vm381_vm2, %v403_v25 }
 0x231   : > { %v449_v26 = vpop.trf.xlu1 }
 0x232   : > { %800 = vst.msk [vmem:[%s286_s9 + $0x8] sm:$0xff] %vm381_vm2, %v449_v26 }
 0x235   : > { %v496_v27 = vpop.trf.xlu0  ;;  %v543_v28 = vpop.trf.xlu1 }
 0x236   : > { %803 = vst.msk [vmem:[%s286_s9 + $0x10] sm:$0xff] %vm381_vm2, %v496_v27  ;;  %806 = vst.msk [vmem:[%s286_s9 + $0x18] sm:$0xff] %vm381_vm2, %v543_v28 }
 0x237   : > { %1044 = shalt.err (!%p1041_p7)
}
 0x238   : > { %s1045_s30 = scalar_lea.hbm %s1441_s6, 512  ;;  %s1049_s17 = scalar_lea.hbm %s1534_s4, 1024 }
 0x239   : > { %p1046_p3 = scmp.ne.s32.totalorder %s1441_s6, %s1045_s30  ;;  %p1050_p6 = scmp.lt.u32.totalorder %s1441_s6, %s1534_s4 }
 0x23a   : > { %p1051_p8 = scmp.lt.u32.totalorder %s1049_s17, %s1045_s30  ;;  %p1053_p11 = scmp.lt.u32.totalorder %s1045_s30, %s1441_s6 }
 0x23b   : > { %p1047_p4 = pnand %p1046_p3, %p1298_p10 }
 0x23c   : > { %p1052_p12 = por %p1051_p8, %p1050_p6 }
 0x23d   : > { %p1048_p13 = pneg %p1047_p4 }
 0x23e   : > { %p1054_p0 = por %p1053_p11, %p1052_p12 }
 0x240   : > { %p1055_p5 = pnand %p1054_p0, %p1048_p13 }
 0x242   : > { %1058 = shalt.err (!%p1055_p5)
}
 0x243   : > { %851 = dma.vmem_to_hbm [thread:$0]  (%p1298_p10), %s1435_s28, 512, %s1441_s6, %s1453_s8, %s1170_s10, %s1170_s10, %s1171_s26  }
 0x244   : > { %s1059_s15 = scalar_lea.vmem %s1443_s12, 512  ;;  %s1173_s21 = smov [#allocation10]  }
 0x245   : > { %p1060_p9 = scmp.ne.s32.totalorder %s1443_s12, %s1059_s15  ;;  %s1063_s25 = sshll.u32 %s1173_s21, 4  ;;  %s1064_s25 = int_to_ptr.vmem [resolvable:$false] %s1063_s25 }
 0x246   : > { %s1065_s30 = scalar_lea.vmem %s1064_s25, 1024  ;;  %p1066_p7 = scmp.lt.s32.totalorder %s1443_s12, %s1064_s25 }
 0x247   : > { %p1061_p1 = pnand %p1060_p9, %p1298_p10  ;;  %p1067_p3 = scmp.lt.s32.totalorder %s1065_s30, %s1059_s15 }
 0x249   : > { %p1062_p2 = pneg %p1061_p1  ;;  %p1068_p4 = por %p1067_p3, %p1066_p7 }
 0x24b   : > { %p1069_p13 = pnand %p1068_p4, %p1062_p2 }
 0x24d   : > { %1072 = shalt.err (!%p1069_p13)
}
 0x24e   : > { %s1073_s28 = scalar_lea.hbm %s1449_s24, 512  ;;  %s1077_s29 = scalar_lea.hbm %s1535_s5, 1024 }
 0x24f   : > { %p1074_p6 = scmp.ne.s32.totalorder %s1449_s24, %s1073_s28  ;;  %p1078_p11 = scmp.lt.u32.totalorder %s1449_s24, %s1535_s5 }
 0x250   : > { %p1079_p0 = scmp.lt.u32.totalorder %s1077_s29, %s1073_s28  ;;  %p1081_p9 = scmp.lt.u32.totalorder %s1073_s28, %s1449_s24 }
 0x251   : > { %p1075_p8 = pnand %p1074_p6, %p1298_p10 }
 0x252   : > { %p1080_p5 = por %p1079_p0, %p1078_p11 }
 0x253   : > { %p1076_p12 = pneg %p1075_p8 }
 0x254   : > { %p1082_p1 = por %p1081_p9, %p1080_p5 }
 0x256   : > { %p1083_p2 = pnand %p1082_p1, %p1076_p12 }
 0x258   : > { %1086 = shalt.err (!%p1083_p2)
}
 0x259   : > { %852 = dma.vmem_to_hbm [thread:$0]  (%p1298_p10), %s1443_s12, 512, %s1449_s24, %s1453_s8, %s1170_s10, %s1170_s10, %s1171_s26  }
 0x25a PF: > { %s640_s16 = sand.u32 1, %s1129_s18   ;;  %p1552_p7 = scmp.ne.s32.totalorder %s1541_s27, 0 }
 0x25b   : > { %p1553_p3 = scmp.ge.s32.totalorder %s1149_s23, 2  ;;  %s641_s15 = scalar_lea.sflag [#allocation4], %s640_s16 }
 0x25d   : > { %p865_p4 = pnand %p1553_p3, %p1552_p7 }
 0x25f   : > { %1120 = dma.done.wait (!%p865_p4), %s641_s15, 512  }
 0x260   : > { %1122 = vsyncadd (!%p865_p4), %s641_s15, 4294966784  ;;  %s1554_s11 = sadd.s32 4294967294, %s1149_s23  }
 0x261   : > { %s649_s21 = sand.u32 1, %s1554_s11  }
 0x262   : > { %s650_s25 = scalar_lea.sflag [#allocation9], %s649_s21 }
 0x263   : > { %1124 = dma.done.wait (!%p865_p4), %s650_s25, 1024  }
 0x264   : > { %1126 = vsyncadd (!%p865_p4), %s650_s25, 4294966272  ;;  %s26_s23 = sadd.s32 1, %s1149_s23   ;;  %s1555_s18 = smov %s1133_s19 }
 0x265   : > { %p23_p10 = scmp.ge.s32.totalorder %s26_s23, 4   ;;  %s1556_s19 = smov %s1137_s20 }
 0x266   : > { %s1557_s20 = smov %s1307_s13  ;;  %s1558_s21 = smov %s1145_s22 }
 0x267   : > { %s1559_s22 = smov %s1561_s7  ;;  %25 = sbr.rel (!%p23_p10) target bundleno = 9 (0x9), region = 122 }
 0x26e   :  { %664 = vsyncpa [#allocation3], 1 }
 0x26f   :  { %666 = vsyncpa [#allocation3 + $0x1], 1 }
 0x270   :  { %667 = vsyncpa [#allocation6], 1 }
 0x271   :  { %668 = vsyncpa [#allocation4], 1 }
 0x272   :  { %670 = vsyncpa [#allocation4 + $0x1], 1 }
 0x273   :  { %671 = vsyncpa [#allocation9], 1 }
 0x274   :  { %673 = vsyncpa [#allocation9 + $0x1], 1 }

</bundles_post_ra>
